<compile_context>
chip_gen: v7x
topology: tpu7x:2x2x1
jax: 0.10.0
libtpu: 0.0.40
codegen_flags: <defaults>
</compile_context>

<pallas_src>
import math

import jax
import jax.numpy as jnp
from jax.experimental import pallas as pl
from jax.experimental.pallas import tpu as pltpu  # noqa: F401  (TPU backend)

# -------- model / problem sizes (small, consistent with the module) --------
BATCH = 2
SEQ = 8
HIDDEN = 32
NUM_HEADS = 4
HEAD_DIM = HIDDEN // NUM_HEADS
MLP_DIM = 64
EPS = 1e-6


def _layer_norm(x, gamma, beta):
    mean = jnp.mean(x, axis=-1, keepdims=True)
    var = jnp.mean((x - mean) ** 2, axis=-1, keepdims=True)
    inv = jax.lax.rsqrt(var + EPS)
    return (x - mean) * inv * gamma + beta


def _gelu(x):
    # TODO(synk): torch.nn.functional.gelu uses the exact erf form; tanh approximation used here.
    c = math.sqrt(2.0 / math.pi)
    return 0.5 * x * (1.0 + jnp.tanh(c * (x + 0.044715 * x * x * x)))


def block_kernel(x_ref, w_attn_ref, w1_ref, w2_ref, p_ref, y_ref, attn_ref):
    """Single-invocation kernel: processes the whole (B*N, H) activation tile.

    x_ref     : (B*N, H)        activations (batch-major rows)
    w_attn_ref: (H, 4H)         [wq | wk | wv | wo]
    w1_ref    : (H, MLP)        fc1 weight
    w2_ref    : (MLP, H)        fc2 weight
    p_ref     : (8, 128)        packed small params (rows zero-padded to 128):
                 row 0 an_g, 1 an_b, 2 fn_g, 3 fn_b, 4 [bq|bk|bv], 5 bo, 6 b1, 7 b2
    y_ref     : (B*N, H)        block output (reshaped to (B,N,H) outside)
    attn_ref  : (B, NH, N, N)   attention weights
    """
    B, N, H, NH, D, M = BATCH, SEQ, HIDDEN, NUM_HEADS, HEAD_DIM, MLP_DIM

    x = x_ref[...]                                  # (B*N, H) f32

    # ---- packed small parameters (loaded once, broadcasts hoisted) ----
    an_g = p_ref[0:1, 0:H]
    an_b = p_ref[1:2, 0:H]
    fn_g = p_ref[2:3, 0:H]
    fn_b = p_ref[3:4, 0:H]
    bqkv = p_ref[4:5, 0:3 * H]
    bo = p_ref[5:6, 0:H]
    b1 = p_ref[6:7, 0:M]
    b2 = p_ref[7:8, 0:H]

    h_res = x

    # ---- attention_norm + fused QKV projection (one MXU matmul) ----
    xn = _layer_norm(x, an_g, an_b)
    qkv = jnp.dot(xn, w_attn_ref[:, 0:3 * H],
                  preferred_element_type=jnp.float32) + bqkv        # (B*N, 3H)

    # ---- per-head attention; output projection accumulated per head ----
    scale = 1.0 / math.sqrt(D)
    attn_out = jnp.zeros((B * N, H), jnp.float32)
    probs_by_batch = [[None] * NH for _ in range(B)]
    for head in range(NH):                          # static unrolled (4 heads)
        wo_h = w_attn_ref[head * D:(head + 1) * D, 3 * H:4 * H]     # (D, H)
        ctx_rows = []
        for b in range(B):                          # static unrolled (2 batch)
            rs = slice(b * N, (b + 1) * N)
            qh = qkv[rs, head * D:(head + 1) * D]
            kh = qkv[rs, H + head * D:H + (head + 1) * D]
            vh = qkv[rs, 2 * H + head * D:2 * H + (head + 1) * D]
            scores = jnp.dot(qh, kh.T, preferred_element_type=jnp.float32) * scale
            scores = scores - jnp.max(scores, axis=-1, keepdims=True)
            e = jnp.exp(scores)
            denom = jnp.sum(e, axis=-1, keepdims=True)
            probs = e * pl.reciprocal(denom, approx=False)          # (N, N)
            probs_by_batch[b][head] = probs
            ctx_rows.append(jnp.dot(probs, vh, preferred_element_type=jnp.float32))
        ctx_all = jnp.concatenate(ctx_rows, axis=0)                 # (B*N, D)
        attn_out = attn_out + jnp.dot(ctx_all, wo_h,
                                      preferred_element_type=jnp.float32)

    # one batched store for the attention weights: (B, NH, N, N)
    attn_ref[...] = jnp.stack(
        [jnp.stack(probs_by_batch[b], axis=0) for b in range(B)], axis=0)

    # ---- output projection bias + residual ----
    x2 = attn_out + bo + h_res
    h2 = x2

    # ---- ffn_norm + MLP + residual ----
    xn2 = _layer_norm(x2, fn_g, fn_b)
    y1 = _gelu(jnp.dot(xn2, w1_ref[...], preferred_element_type=jnp.float32) + b1)
    y2 = jnp.dot(y1, w2_ref[...], preferred_element_type=jnp.float32) + b2
    y_ref[...] = (y2 + h2).astype(y_ref.dtype)                      # (B*N, H)


def _pad_lanes(v, width=128):
    return jnp.pad(v, ((0, 0), (0, width - v.shape[1])))


@jax.jit
def block_forward(x, params):
    (an_g, an_b, wq, bq, wk, bk, wv, bv, wo, bo,
     fn_g, fn_b, w1, b1, w2, b2) = params
    B, N, H = x.shape

    # fuse QKV + output projection weights: (H, 4H) = (32, 128)
    w_attn = jnp.concatenate([wq, wk, wv, wo], axis=1)
    bqkv = jnp.concatenate([bq, bk, bv], axis=1)                    # (1, 3H)
    # pack all small vectors into a single (8, 128) slab -> one DMA
    p_slab = jnp.concatenate(
        [_pad_lanes(v) for v in (an_g, an_b, fn_g, fn_b, bqkv, bo, b1, b2)],
        axis=0)

    # No grid: single kernel invocation, whole arrays resident in VMEM
    # (everything is a few KiB, far below any generation's VMEM budget).
    y_flat, attn = pl.pallas_call(
        block_kernel,
        out_shape=(
            jax.ShapeDtypeStruct((B * N, H), jnp.float32),
            jax.ShapeDtypeStruct((B, NUM_HEADS, N, N), jnp.float32),
        ),
    )(x.reshape(B * N, H), w_attn, w1, w2, p_slab)

    return y_flat.reshape(B, N, H), attn


# ------------------------- pure-JAX reference -------------------------
def block_reference(x, params):
    (an_g, an_b, wq, bq, wk, bk, wv, bv, wo, bo,
     fn_g, fn_b, w1, b1, w2, b2) = params
    h = x
    xn = _layer_norm(x, an_g, an_b)
    q = xn @ wq + bq
    k = xn @ wk + bk
    v = xn @ wv + bv
    B, N, _ = x.shape
    qh = q.reshape(B, N, NUM_HEADS, HEAD_DIM).transpose(0, 2, 1, 3)
    kh = k.reshape(B, N, NUM_HEADS, HEAD_DIM).transpose(0, 2, 1, 3)
    vh = v.reshape(B, N, NUM_HEADS, HEAD_DIM).transpose(0, 2, 1, 3)
    scores = jnp.einsum("bhnd,bhmd->bhnm", qh, kh) / math.sqrt(HEAD_DIM)
    probs = jax.nn.softmax(scores, axis=-1)
    ctx = jnp.einsum("bhnm,bhmd->bhnd", probs, vh).transpose(0, 2, 1, 3).reshape(B, N, HIDDEN)
    x = ctx @ wo + bo + h
    h = x
    xn2 = _layer_norm(x, fn_g, fn_b)
    y = _gelu(xn2 @ w1 + b1) @ w2 + b2 + h
    return y, probs


def make_params(key):
    ks = jax.random.split(key, 8)
    std = 0.02
    an_g = jnp.ones((1, HIDDEN), jnp.float32)
    an_b = jnp.zeros((1, HIDDEN), jnp.float32)
    fn_g = jnp.ones((1, HIDDEN), jnp.float32)
    fn_b = jnp.zeros((1, HIDDEN), jnp.float32)
    wq = std * jax.random.normal(ks[0], (HIDDEN, HIDDEN), jnp.float32)
    wk = std * jax.random.normal(ks[1], (HIDDEN, HIDDEN), jnp.float32)
    wv = std * jax.random.normal(ks[2], (HIDDEN, HIDDEN), jnp.float32)
    wo = std * jax.random.normal(ks[3], (HIDDEN, HIDDEN), jnp.float32)
    bq = jnp.zeros((1, HIDDEN), jnp.float32)
    bk = jnp.zeros((1, HIDDEN), jnp.float32)
    bv = jnp.zeros((1, HIDDEN), jnp.float32)
    bo = jnp.zeros((1, HIDDEN), jnp.float32)
    w1 = std * jax.random.normal(ks[4], (HIDDEN, MLP_DIM), jnp.float32)
    b1 = jnp.full((1, MLP_DIM), 1e-6, jnp.float32)   # ViT Mlp uses normal_(bias, std=1e-6)
    w2 = std * jax.random.normal(ks[5], (MLP_DIM, HIDDEN), jnp.float32)
    b2 = jnp.full((1, HIDDEN), 1e-6, jnp.float32)
    return (an_g, an_b, wq, bq, wk, bk, wv, bv, wo, bo,
            fn_g, fn_b, w1, b1, w2, b2)


if __name__ == "__main__":
    key = jax.random.PRNGKey(0)
    kx, kp = jax.random.split(key)
    x = jax.random.normal(kx, (BATCH, SEQ, HIDDEN), jnp.float32)
    params = make_params(kp)

    y, attn_w = block_forward(x, params)
    jax.block_until_ready((y, attn_w))

    y_ref, attn_ref = block_reference(x, params)
    assert y.shape == (BATCH, SEQ, HIDDEN)
    assert attn_w.shape == (BATCH, NUM_HEADS, SEQ, SEQ)
    assert jnp.allclose(y, y_ref, atol=1e-4, rtol=1e-4), "output mismatch"
    assert jnp.allclose(attn_w, attn_ref, atol=1e-5, rtol=1e-5), "attention weights mismatch"

    print("KERNEL_OK")
</pallas_src>

<mosaic_0001>
module attributes {stable_mosaic.version = 11 : i64} {
  func.func @block_kernel(%arg0: memref<16x32xf32, #tpu.memory_space<vmem>>, %arg1: memref<32x128xf32, #tpu.memory_space<vmem>>, %arg2: memref<32x64xf32, #tpu.memory_space<vmem>>, %arg3: memref<64x32xf32, #tpu.memory_space<vmem>>, %arg4: memref<8x128xf32, #tpu.memory_space<vmem>>, %arg5: memref<16x32xf32, #tpu.memory_space<vmem>>, %arg6: memref<2x4x8x8xf32, #tpu.memory_space<vmem>>) attributes {dimension_semantics = [], scalar_prefetch = 0 : i64, scratch_operands = 0 : i64, tpu.core_type = #tpu.core_type<tc>} {
    %c0 = arith.constant 0 : index
    %c0_0 = arith.constant 0 : index
    %0 = vector.load %arg0[%c0, %c0_0] : memref<16x32xf32, #tpu.memory_space<vmem>>, vector<16x32xf32>
    %c0_1 = arith.constant 0 : index
    %c0_2 = arith.constant 0 : index
    %1 = vector.load %arg4[%c0_1, %c0_2] : memref<8x128xf32, #tpu.memory_space<vmem>>, vector<1x32xf32>
    %c1 = arith.constant 1 : index
    %c0_3 = arith.constant 0 : index
    %2 = vector.load %arg4[%c1, %c0_3] : memref<8x128xf32, #tpu.memory_space<vmem>>, vector<1x32xf32>
    %c2 = arith.constant 2 : index
    %c0_4 = arith.constant 0 : index
    %3 = vector.load %arg4[%c2, %c0_4] : memref<8x128xf32, #tpu.memory_space<vmem>>, vector<1x32xf32>
    %c3 = arith.constant 3 : index
    %c0_5 = arith.constant 0 : index
    %4 = vector.load %arg4[%c3, %c0_5] : memref<8x128xf32, #tpu.memory_space<vmem>>, vector<1x32xf32>
    %c4 = arith.constant 4 : index
    %c0_6 = arith.constant 0 : index
    %5 = vector.load %arg4[%c4, %c0_6] : memref<8x128xf32, #tpu.memory_space<vmem>>, vector<1x96xf32>
    %c5 = arith.constant 5 : index
    %c0_7 = arith.constant 0 : index
    %6 = vector.load %arg4[%c5, %c0_7] : memref<8x128xf32, #tpu.memory_space<vmem>>, vector<1x32xf32>
    %c6 = arith.constant 6 : index
    %c0_8 = arith.constant 0 : index
    %7 = vector.load %arg4[%c6, %c0_8] : memref<8x128xf32, #tpu.memory_space<vmem>>, vector<1x64xf32>
    %c7 = arith.constant 7 : index
    %c0_9 = arith.constant 0 : index
    %8 = vector.load %arg4[%c7, %c0_9] : memref<8x128xf32, #tpu.memory_space<vmem>>, vector<1x32xf32>
    %cst = arith.constant dense<0.000000e+00> : vector<16xf32>
    %9 = vector.multi_reduction <add>, %0, %cst [1] : vector<16x32xf32> to vector<16xf32>
    %10 = vector.shape_cast %9 : vector<16xf32> to vector<16x1xf32>
    %cst_10 = arith.constant 3.200000e+01 : f32
    %11 = vector.broadcast %cst_10 : f32 to vector<16x1xf32>
    %12 = arith.divf %10, %11 : vector<16x1xf32>
    %13 = vector.broadcast %12 : vector<16x1xf32> to vector<16x32xf32>
    %14 = arith.subf %0, %13 : vector<16x32xf32>
    %15 = arith.mulf %14, %14 : vector<16x32xf32>
    %cst_11 = arith.constant dense<0.000000e+00> : vector<16xf32>
    %16 = vector.multi_reduction <add>, %15, %cst_11 [1] : vector<16x32xf32> to vector<16xf32>
    %17 = vector.shape_cast %16 : vector<16xf32> to vector<16x1xf32>
    %cst_12 = arith.constant 3.200000e+01 : f32
    %18 = vector.broadcast %cst_12 : f32 to vector<16x1xf32>
    %19 = arith.divf %17, %18 : vector<16x1xf32>
    %cst_13 = arith.constant 9.99999997E-7 : f32
    %20 = vector.broadcast %cst_13 : f32 to vector<16x1xf32>
    %21 = arith.addf %19, %20 : vector<16x1xf32>
    %22 = math.rsqrt %21 : vector<16x1xf32>
    %23 = vector.broadcast %12 : vector<16x1xf32> to vector<16x32xf32>
    %24 = arith.subf %0, %23 : vector<16x32xf32>
    %25 = vector.broadcast %22 : vector<16x1xf32> to vector<16x32xf32>
    %26 = arith.mulf %24, %25 : vector<16x32xf32>
    %27 = vector.broadcast %1 : vector<1x32xf32> to vector<16x32xf32>
    %28 = arith.mulf %26, %27 : vector<16x32xf32>
    %29 = vector.broadcast %2 : vector<1x32xf32> to vector<16x32xf32>
    %30 = arith.addf %28, %29 : vector<16x32xf32>
    %c0_14 = arith.constant 0 : index
    %c0_15 = arith.constant 0 : index
    %31 = vector.load %arg1[%c0_14, %c0_15] : memref<32x128xf32, #tpu.memory_space<vmem>>, vector<32x96xf32>
    %cst_16 = arith.constant dense<0.000000e+00> : vector<16x96xf32>
    %32 = tpu.matmul %30, %31, %cst_16 {dimension_numbers = #tpu.dot_dimension_numbers<[1], [0], [0], [1], [0, 0, 1, 1], [], []>} : vector<16x32xf32>, vector<32x96xf32>, vector<16x96xf32> -> vector<16x96xf32>
    %33 = vector.broadcast %5 : vector<1x96xf32> to vector<16x96xf32>
    %34 = arith.addf %32, %33 : vector<16x96xf32>
    %cst_17 = arith.constant 0.000000e+00 : f32
    %35 = vector.broadcast %cst_17 : f32 to vector<16x32xf32>
    %c0_18 = arith.constant 0 : index
    %c96 = arith.constant 96 : index
    %36 = vector.load %arg1[%c0_18, %c96] : memref<32x128xf32, #tpu.memory_space<vmem>>, vector<8x32xf32>
    %37 = vector.extract_strided_slice %34 {offsets = [0, 0], sizes = [8, 8], strides = [1, 1]} : vector<16x96xf32> to vector<8x8xf32>
    %38 = vector.extract_strided_slice %34 {offsets = [0, 32], sizes = [8, 8], strides = [1, 1]} : vector<16x96xf32> to vector<8x8xf32>
    %39 = vector.extract_strided_slice %34 {offsets = [0, 64], sizes = [8, 8], strides = [1, 1]} : vector<16x96xf32> to vector<8x8xf32>
    %40 = tpu.transpose %38, [1, 0] : vector<8x8xf32> -> vector<8x8xf32>
    %cst_19 = arith.constant dense<0.000000e+00> : vector<8x8xf32>
    %41 = tpu.matmul %37, %40, %cst_19 {dimension_numbers = #tpu.dot_dimension_numbers<[1], [0], [0], [1], [0, 0, 1, 1], [], []>} : vector<8x8xf32>, vector<8x8xf32>, vector<8x8xf32> -> vector<8x8xf32>
    %cst_20 = arith.constant 0.353553385 : f32
    %42 = vector.broadcast %cst_20 : f32 to vector<8x8xf32>
    %43 = arith.mulf %41, %42 : vector<8x8xf32>
    %cst_21 = arith.constant dense<0xFF800000> : vector<8xf32>
    %44 = vector.multi_reduction <maximumf>, %43, %cst_21 [1] : vector<8x8xf32> to vector<8xf32>
    %45 = vector.shape_cast %44 : vector<8xf32> to vector<8x1xf32>
    %46 = vector.broadcast %45 : vector<8x1xf32> to vector<8x8xf32>
    %47 = arith.subf %43, %46 : vector<8x8xf32>
    %48 = math.exp %47 : vector<8x8xf32>
    %cst_22 = arith.constant dense<0.000000e+00> : vector<8xf32>
    %49 = vector.multi_reduction <add>, %48, %cst_22 [1] : vector<8x8xf32> to vector<8xf32>
    %50 = vector.shape_cast %49 : vector<8xf32> to vector<8x1xf32>
    %51 = tpu.reciprocal %50 : vector<8x1xf32> -> vector<8x1xf32>
    %52 = vector.broadcast %51 : vector<8x1xf32> to vector<8x8xf32>
    %53 = arith.mulf %48, %52 : vector<8x8xf32>
    %cst_23 = arith.constant dense<0.000000e+00> : vector<8x8xf32>
    %54 = tpu.matmul %53, %39, %cst_23 {dimension_numbers = #tpu.dot_dimension_numbers<[1], [0], [0], [1], [0, 0, 1, 1], [], []>} : vector<8x8xf32>, vector<8x8xf32>, vector<8x8xf32> -> vector<8x8xf32>
    %55 = vector.extract_strided_slice %34 {offsets = [8, 0], sizes = [8, 8], strides = [1, 1]} : vector<16x96xf32> to vector<8x8xf32>
    %56 = vector.extract_strided_slice %34 {offsets = [8, 32], sizes = [8, 8], strides = [1, 1]} : vector<16x96xf32> to vector<8x8xf32>
    %57 = vector.extract_strided_slice %34 {offsets = [8, 64], sizes = [8, 8], strides = [1, 1]} : vector<16x96xf32> to vector<8x8xf32>
    %58 = tpu.transpose %56, [1, 0] : vector<8x8xf32> -> vector<8x8xf32>
    %cst_24 = arith.constant dense<0.000000e+00> : vector<8x8xf32>
    %59 = tpu.matmul %55, %58, %cst_24 {dimension_numbers = #tpu.dot_dimension_numbers<[1], [0], [0], [1], [0, 0, 1, 1], [], []>} : vector<8x8xf32>, vector<8x8xf32>, vector<8x8xf32> -> vector<8x8xf32>
    %cst_25 = arith.constant 0.353553385 : f32
    %60 = vector.broadcast %cst_25 : f32 to vector<8x8xf32>
    %61 = arith.mulf %59, %60 : vector<8x8xf32>
    %cst_26 = arith.constant dense<0xFF800000> : vector<8xf32>
    %62 = vector.multi_reduction <maximumf>, %61, %cst_26 [1] : vector<8x8xf32> to vector<8xf32>
    %63 = vector.shape_cast %62 : vector<8xf32> to vector<8x1xf32>
    %64 = vector.broadcast %63 : vector<8x1xf32> to vector<8x8xf32>
    %65 = arith.subf %61, %64 : vector<8x8xf32>
    %66 = math.exp %65 : vector<8x8xf32>
    %cst_27 = arith.constant dense<0.000000e+00> : vector<8xf32>
    %67 = vector.multi_reduction <add>, %66, %cst_27 [1] : vector<8x8xf32> to vector<8xf32>
    %68 = vector.shape_cast %67 : vector<8xf32> to vector<8x1xf32>
    %69 = tpu.reciprocal %68 : vector<8x1xf32> -> vector<8x1xf32>
    %70 = vector.broadcast %69 : vector<8x1xf32> to vector<8x8xf32>
    %71 = arith.mulf %66, %70 : vector<8x8xf32>
    %cst_28 = arith.constant dense<0.000000e+00> : vector<8x8xf32>
    %72 = tpu.matmul %71, %57, %cst_28 {dimension_numbers = #tpu.dot_dimension_numbers<[1], [0], [0], [1], [0, 0, 1, 1], [], []>} : vector<8x8xf32>, vector<8x8xf32>, vector<8x8xf32> -> vector<8x8xf32>
    %73 = tpu.concatenate %54, %72 in 0 : vector<8x8xf32>, vector<8x8xf32> -> vector<16x8xf32>
    %cst_29 = arith.constant dense<0.000000e+00> : vector<16x32xf32>
    %74 = tpu.matmul %73, %36, %cst_29 {dimension_numbers = #tpu.dot_dimension_numbers<[1], [0], [0], [1], [0, 0, 1, 1], [], []>} : vector<16x8xf32>, vector<8x32xf32>, vector<16x32xf32> -> vector<16x32xf32>
    %75 = arith.addf %35, %74 : vector<16x32xf32>
    %c8 = arith.constant 8 : index
    %c96_30 = arith.constant 96 : index
    %76 = vector.load %arg1[%c8, %c96_30] : memref<32x128xf32, #tpu.memory_space<vmem>>, vector<8x32xf32>
    %77 = vector.extract_strided_slice %34 {offsets = [0, 8], sizes = [8, 8], strides = [1, 1]} : vector<16x96xf32> to vector<8x8xf32>
    %78 = vector.extract_strided_slice %34 {offsets = [0, 40], sizes = [8, 8], strides = [1, 1]} : vector<16x96xf32> to vector<8x8xf32>
    %79 = vector.extract_strided_slice %34 {offsets = [0, 72], sizes = [8, 8], strides = [1, 1]} : vector<16x96xf32> to vector<8x8xf32>
    %80 = tpu.transpose %78, [1, 0] : vector<8x8xf32> -> vector<8x8xf32>
    %cst_31 = arith.constant dense<0.000000e+00> : vector<8x8xf32>
    %81 = tpu.matmul %77, %80, %cst_31 {dimension_numbers = #tpu.dot_dimension_numbers<[1], [0], [0], [1], [0, 0, 1, 1], [], []>} : vector<8x8xf32>, vector<8x8xf32>, vector<8x8xf32> -> vector<8x8xf32>
    %cst_32 = arith.constant 0.353553385 : f32
    %82 = vector.broadcast %cst_32 : f32 to vector<8x8xf32>
    %83 = arith.mulf %81, %82 : vector<8x8xf32>
    %cst_33 = arith.constant dense<0xFF800000> : vector<8xf32>
    %84 = vector.multi_reduction <maximumf>, %83, %cst_33 [1] : vector<8x8xf32> to vector<8xf32>
    %85 = vector.shape_cast %84 : vector<8xf32> to vector<8x1xf32>
    %86 = vector.broadcast %85 : vector<8x1xf32> to vector<8x8xf32>
    %87 = arith.subf %83, %86 : vector<8x8xf32>
    %88 = math.exp %87 : vector<8x8xf32>
    %cst_34 = arith.constant dense<0.000000e+00> : vector<8xf32>
    %89 = vector.multi_reduction <add>, %88, %cst_34 [1] : vector<8x8xf32> to vector<8xf32>
    %90 = vector.shape_cast %89 : vector<8xf32> to vector<8x1xf32>
    %91 = tpu.reciprocal %90 : vector<8x1xf32> -> vector<8x1xf32>
    %92 = vector.broadcast %91 : vector<8x1xf32> to vector<8x8xf32>
    %93 = arith.mulf %88, %92 : vector<8x8xf32>
    %cst_35 = arith.constant dense<0.000000e+00> : vector<8x8xf32>
    %94 = tpu.matmul %93, %79, %cst_35 {dimension_numbers = #tpu.dot_dimension_numbers<[1], [0], [0], [1], [0, 0, 1, 1], [], []>} : vector<8x8xf32>, vector<8x8xf32>, vector<8x8xf32> -> vector<8x8xf32>
    %95 = vector.extract_strided_slice %34 {offsets = [8, 8], sizes = [8, 8], strides = [1, 1]} : vector<16x96xf32> to vector<8x8xf32>
    %96 = vector.extract_strided_slice %34 {offsets = [8, 40], sizes = [8, 8], strides = [1, 1]} : vector<16x96xf32> to vector<8x8xf32>
    %97 = vector.extract_strided_slice %34 {offsets = [8, 72], sizes = [8, 8], strides = [1, 1]} : vector<16x96xf32> to vector<8x8xf32>
    %98 = tpu.transpose %96, [1, 0] : vector<8x8xf32> -> vector<8x8xf32>
    %cst_36 = arith.constant dense<0.000000e+00> : vector<8x8xf32>
    %99 = tpu.matmul %95, %98, %cst_36 {dimension_numbers = #tpu.dot_dimension_numbers<[1], [0], [0], [1], [0, 0, 1, 1], [], []>} : vector<8x8xf32>, vector<8x8xf32>, vector<8x8xf32> -> vector<8x8xf32>
    %cst_37 = arith.constant 0.353553385 : f32
    %100 = vector.broadcast %cst_37 : f32 to vector<8x8xf32>
    %101 = arith.mulf %99, %100 : vector<8x8xf32>
    %cst_38 = arith.constant dense<0xFF800000> : vector<8xf32>
    %102 = vector.multi_reduction <maximumf>, %101, %cst_38 [1] : vector<8x8xf32> to vector<8xf32>
    %103 = vector.shape_cast %102 : vector<8xf32> to vector<8x1xf32>
    %104 = vector.broadcast %103 : vector<8x1xf32> to vector<8x8xf32>
    %105 = arith.subf %101, %104 : vector<8x8xf32>
    %106 = math.exp %105 : vector<8x8xf32>
    %cst_39 = arith.constant dense<0.000000e+00> : vector<8xf32>
    %107 = vector.multi_reduction <add>, %106, %cst_39 [1] : vector<8x8xf32> to vector<8xf32>
    %108 = vector.shape_cast %107 : vector<8xf32> to vector<8x1xf32>
    %109 = tpu.reciprocal %108 : vector<8x1xf32> -> vector<8x1xf32>
    %110 = vector.broadcast %109 : vector<8x1xf32> to vector<8x8xf32>
    %111 = arith.mulf %106, %110 : vector<8x8xf32>
    %cst_40 = arith.constant dense<0.000000e+00> : vector<8x8xf32>
    %112 = tpu.matmul %111, %97, %cst_40 {dimension_numbers = #tpu.dot_dimension_numbers<[1], [0], [0], [1], [0, 0, 1, 1], [], []>} : vector<8x8xf32>, vector<8x8xf32>, vector<8x8xf32> -> vector<8x8xf32>
    %113 = tpu.concatenate %94, %112 in 0 : vector<8x8xf32>, vector<8x8xf32> -> vector<16x8xf32>
    %cst_41 = arith.constant dense<0.000000e+00> : vector<16x32xf32>
    %114 = tpu.matmul %113, %76, %cst_41 {dimension_numbers = #tpu.dot_dimension_numbers<[1], [0], [0], [1], [0, 0, 1, 1], [], []>} : vector<16x8xf32>, vector<8x32xf32>, vector<16x32xf32> -> vector<16x32xf32>
    %115 = arith.addf %75, %114 : vector<16x32xf32>
    %c16 = arith.constant 16 : index
    %c96_42 = arith.constant 96 : index
    %116 = vector.load %arg1[%c16, %c96_42] : memref<32x128xf32, #tpu.memory_space<vmem>>, vector<8x32xf32>
    %117 = vector.extract_strided_slice %34 {offsets = [0, 16], sizes = [8, 8], strides = [1, 1]} : vector<16x96xf32> to vector<8x8xf32>
    %118 = vector.extract_strided_slice %34 {offsets = [0, 48], sizes = [8, 8], strides = [1, 1]} : vector<16x96xf32> to vector<8x8xf32>
    %119 = vector.extract_strided_slice %34 {offsets = [0, 80], sizes = [8, 8], strides = [1, 1]} : vector<16x96xf32> to vector<8x8xf32>
    %120 = tpu.transpose %118, [1, 0] : vector<8x8xf32> -> vector<8x8xf32>
    %cst_43 = arith.constant dense<0.000000e+00> : vector<8x8xf32>
    %121 = tpu.matmul %117, %120, %cst_43 {dimension_numbers = #tpu.dot_dimension_numbers<[1], [0], [0], [1], [0, 0, 1, 1], [], []>} : vector<8x8xf32>, vector<8x8xf32>, vector<8x8xf32> -> vector<8x8xf32>
    %cst_44 = arith.constant 0.353553385 : f32
    %122 = vector.broadcast %cst_44 : f32 to vector<8x8xf32>
    %123 = arith.mulf %121, %122 : vector<8x8xf32>
    %cst_45 = arith.constant dense<0xFF800000> : vector<8xf32>
    %124 = vector.multi_reduction <maximumf>, %123, %cst_45 [1] : vector<8x8xf32> to vector<8xf32>
    %125 = vector.shape_cast %124 : vector<8xf32> to vector<8x1xf32>
    %126 = vector.broadcast %125 : vector<8x1xf32> to vector<8x8xf32>
    %127 = arith.subf %123, %126 : vector<8x8xf32>
    %128 = math.exp %127 : vector<8x8xf32>
    %cst_46 = arith.constant dense<0.000000e+00> : vector<8xf32>
    %129 = vector.multi_reduction <add>, %128, %cst_46 [1] : vector<8x8xf32> to vector<8xf32>
    %130 = vector.shape_cast %129 : vector<8xf32> to vector<8x1xf32>
    %131 = tpu.reciprocal %130 : vector<8x1xf32> -> vector<8x1xf32>
    %132 = vector.broadcast %131 : vector<8x1xf32> to vector<8x8xf32>
    %133 = arith.mulf %128, %132 : vector<8x8xf32>
    %cst_47 = arith.constant dense<0.000000e+00> : vector<8x8xf32>
    %134 = tpu.matmul %133, %119, %cst_47 {dimension_numbers = #tpu.dot_dimension_numbers<[1], [0], [0], [1], [0, 0, 1, 1], [], []>} : vector<8x8xf32>, vector<8x8xf32>, vector<8x8xf32> -> vector<8x8xf32>
    %135 = vector.extract_strided_slice %34 {offsets = [8, 16], sizes = [8, 8], strides = [1, 1]} : vector<16x96xf32> to vector<8x8xf32>
    %136 = vector.extract_strided_slice %34 {offsets = [8, 48], sizes = [8, 8], strides = [1, 1]} : vector<16x96xf32> to vector<8x8xf32>
    %137 = vector.extract_strided_slice %34 {offsets = [8, 80], sizes = [8, 8], strides = [1, 1]} : vector<16x96xf32> to vector<8x8xf32>
    %138 = tpu.transpose %136, [1, 0] : vector<8x8xf32> -> vector<8x8xf32>
    %cst_48 = arith.constant dense<0.000000e+00> : vector<8x8xf32>
    %139 = tpu.matmul %135, %138, %cst_48 {dimension_numbers = #tpu.dot_dimension_numbers<[1], [0], [0], [1], [0, 0, 1, 1], [], []>} : vector<8x8xf32>, vector<8x8xf32>, vector<8x8xf32> -> vector<8x8xf32>
    %cst_49 = arith.constant 0.353553385 : f32
    %140 = vector.broadcast %cst_49 : f32 to vector<8x8xf32>
    %141 = arith.mulf %139, %140 : vector<8x8xf32>
    %cst_50 = arith.constant dense<0xFF800000> : vector<8xf32>
    %142 = vector.multi_reduction <maximumf>, %141, %cst_50 [1] : vector<8x8xf32> to vector<8xf32>
    %143 = vector.shape_cast %142 : vector<8xf32> to vector<8x1xf32>
    %144 = vector.broadcast %143 : vector<8x1xf32> to vector<8x8xf32>
    %145 = arith.subf %141, %144 : vector<8x8xf32>
    %146 = math.exp %145 : vector<8x8xf32>
    %cst_51 = arith.constant dense<0.000000e+00> : vector<8xf32>
    %147 = vector.multi_reduction <add>, %146, %cst_51 [1] : vector<8x8xf32> to vector<8xf32>
    %148 = vector.shape_cast %147 : vector<8xf32> to vector<8x1xf32>
    %149 = tpu.reciprocal %148 : vector<8x1xf32> -> vector<8x1xf32>
    %150 = vector.broadcast %149 : vector<8x1xf32> to vector<8x8xf32>
    %151 = arith.mulf %146, %150 : vector<8x8xf32>
    %cst_52 = arith.constant dense<0.000000e+00> : vector<8x8xf32>
    %152 = tpu.matmul %151, %137, %cst_52 {dimension_numbers = #tpu.dot_dimension_numbers<[1], [0], [0], [1], [0, 0, 1, 1], [], []>} : vector<8x8xf32>, vector<8x8xf32>, vector<8x8xf32> -> vector<8x8xf32>
    %153 = tpu.concatenate %134, %152 in 0 : vector<8x8xf32>, vector<8x8xf32> -> vector<16x8xf32>
    %cst_53 = arith.constant dense<0.000000e+00> : vector<16x32xf32>
    %154 = tpu.matmul %153, %116, %cst_53 {dimension_numbers = #tpu.dot_dimension_numbers<[1], [0], [0], [1], [0, 0, 1, 1], [], []>} : vector<16x8xf32>, vector<8x32xf32>, vector<16x32xf32> -> vector<16x32xf32>
    %155 = arith.addf %115, %154 : vector<16x32xf32>
    %c24 = arith.constant 24 : index
    %c96_54 = arith.constant 96 : index
    %156 = vector.load %arg1[%c24, %c96_54] : memref<32x128xf32, #tpu.memory_space<vmem>>, vector<8x32xf32>
    %157 = vector.extract_strided_slice %34 {offsets = [0, 24], sizes = [8, 8], strides = [1, 1]} : vector<16x96xf32> to vector<8x8xf32>
    %158 = vector.extract_strided_slice %34 {offsets = [0, 56], sizes = [8, 8], strides = [1, 1]} : vector<16x96xf32> to vector<8x8xf32>
    %159 = vector.extract_strided_slice %34 {offsets = [0, 88], sizes = [8, 8], strides = [1, 1]} : vector<16x96xf32> to vector<8x8xf32>
    %160 = tpu.transpose %158, [1, 0] : vector<8x8xf32> -> vector<8x8xf32>
    %cst_55 = arith.constant dense<0.000000e+00> : vector<8x8xf32>
    %161 = tpu.matmul %157, %160, %cst_55 {dimension_numbers = #tpu.dot_dimension_numbers<[1], [0], [0], [1], [0, 0, 1, 1], [], []>} : vector<8x8xf32>, vector<8x8xf32>, vector<8x8xf32> -> vector<8x8xf32>
    %cst_56 = arith.constant 0.353553385 : f32
    %162 = vector.broadcast %cst_56 : f32 to vector<8x8xf32>
    %163 = arith.mulf %161, %162 : vector<8x8xf32>
    %cst_57 = arith.constant dense<0xFF800000> : vector<8xf32>
    %164 = vector.multi_reduction <maximumf>, %163, %cst_57 [1] : vector<8x8xf32> to vector<8xf32>
    %165 = vector.shape_cast %164 : vector<8xf32> to vector<8x1xf32>
    %166 = vector.broadcast %165 : vector<8x1xf32> to vector<8x8xf32>
    %167 = arith.subf %163, %166 : vector<8x8xf32>
    %168 = math.exp %167 : vector<8x8xf32>
    %cst_58 = arith.constant dense<0.000000e+00> : vector<8xf32>
    %169 = vector.multi_reduction <add>, %168, %cst_58 [1] : vector<8x8xf32> to vector<8xf32>
    %170 = vector.shape_cast %169 : vector<8xf32> to vector<8x1xf32>
    %171 = tpu.reciprocal %170 : vector<8x1xf32> -> vector<8x1xf32>
    %172 = vector.broadcast %171 : vector<8x1xf32> to vector<8x8xf32>
    %173 = arith.mulf %168, %172 : vector<8x8xf32>
    %cst_59 = arith.constant dense<0.000000e+00> : vector<8x8xf32>
    %174 = tpu.matmul %173, %159, %cst_59 {dimension_numbers = #tpu.dot_dimension_numbers<[1], [0], [0], [1], [0, 0, 1, 1], [], []>} : vector<8x8xf32>, vector<8x8xf32>, vector<8x8xf32> -> vector<8x8xf32>
    %175 = vector.extract_strided_slice %34 {offsets = [8, 24], sizes = [8, 8], strides = [1, 1]} : vector<16x96xf32> to vector<8x8xf32>
    %176 = vector.extract_strided_slice %34 {offsets = [8, 56], sizes = [8, 8], strides = [1, 1]} : vector<16x96xf32> to vector<8x8xf32>
    %177 = vector.extract_strided_slice %34 {offsets = [8, 88], sizes = [8, 8], strides = [1, 1]} : vector<16x96xf32> to vector<8x8xf32>
    %178 = tpu.transpose %176, [1, 0] : vector<8x8xf32> -> vector<8x8xf32>
    %cst_60 = arith.constant dense<0.000000e+00> : vector<8x8xf32>
    %179 = tpu.matmul %175, %178, %cst_60 {dimension_numbers = #tpu.dot_dimension_numbers<[1], [0], [0], [1], [0, 0, 1, 1], [], []>} : vector<8x8xf32>, vector<8x8xf32>, vector<8x8xf32> -> vector<8x8xf32>
    %cst_61 = arith.constant 0.353553385 : f32
    %180 = vector.broadcast %cst_61 : f32 to vector<8x8xf32>
    %181 = arith.mulf %179, %180 : vector<8x8xf32>
    %cst_62 = arith.constant dense<0xFF800000> : vector<8xf32>
    %182 = vector.multi_reduction <maximumf>, %181, %cst_62 [1] : vector<8x8xf32> to vector<8xf32>
    %183 = vector.shape_cast %182 : vector<8xf32> to vector<8x1xf32>
    %184 = vector.broadcast %183 : vector<8x1xf32> to vector<8x8xf32>
    %185 = arith.subf %181, %184 : vector<8x8xf32>
    %186 = math.exp %185 : vector<8x8xf32>
    %cst_63 = arith.constant dense<0.000000e+00> : vector<8xf32>
    %187 = vector.multi_reduction <add>, %186, %cst_63 [1] : vector<8x8xf32> to vector<8xf32>
    %188 = vector.shape_cast %187 : vector<8xf32> to vector<8x1xf32>
    %189 = tpu.reciprocal %188 : vector<8x1xf32> -> vector<8x1xf32>
    %190 = vector.broadcast %189 : vector<8x1xf32> to vector<8x8xf32>
    %191 = arith.mulf %186, %190 : vector<8x8xf32>
    %cst_64 = arith.constant dense<0.000000e+00> : vector<8x8xf32>
    %192 = tpu.matmul %191, %177, %cst_64 {dimension_numbers = #tpu.dot_dimension_numbers<[1], [0], [0], [1], [0, 0, 1, 1], [], []>} : vector<8x8xf32>, vector<8x8xf32>, vector<8x8xf32> -> vector<8x8xf32>
    %193 = tpu.concatenate %174, %192 in 0 : vector<8x8xf32>, vector<8x8xf32> -> vector<16x8xf32>
    %cst_65 = arith.constant dense<0.000000e+00> : vector<16x32xf32>
    %194 = tpu.matmul %193, %156, %cst_65 {dimension_numbers = #tpu.dot_dimension_numbers<[1], [0], [0], [1], [0, 0, 1, 1], [], []>} : vector<16x8xf32>, vector<8x32xf32>, vector<16x32xf32> -> vector<16x32xf32>
    %195 = arith.addf %155, %194 : vector<16x32xf32>
    %196 = vector.shape_cast %53 : vector<8x8xf32> to vector<1x8x8xf32>
    %197 = vector.shape_cast %93 : vector<8x8xf32> to vector<1x8x8xf32>
    %198 = vector.shape_cast %133 : vector<8x8xf32> to vector<1x8x8xf32>
    %199 = vector.shape_cast %173 : vector<8x8xf32> to vector<1x8x8xf32>
    %200 = tpu.concatenate %196, %197, %198, %199 in 0 : vector<1x8x8xf32>, vector<1x8x8xf32>, vector<1x8x8xf32>, vector<1x8x8xf32> -> vector<4x8x8xf32>
    %201 = vector.shape_cast %71 : vector<8x8xf32> to vector<1x8x8xf32>
    %202 = vector.shape_cast %111 : vector<8x8xf32> to vector<1x8x8xf32>
    %203 = vector.shape_cast %151 : vector<8x8xf32> to vector<1x8x8xf32>
    %204 = vector.shape_cast %191 : vector<8x8xf32> to vector<1x8x8xf32>
    %205 = tpu.concatenate %201, %202, %203, %204 in 0 : vector<1x8x8xf32>, vector<1x8x8xf32>, vector<1x8x8xf32>, vector<1x8x8xf32> -> vector<4x8x8xf32>
    %206 = vector.shape_cast %200 : vector<4x8x8xf32> to vector<1x4x8x8xf32>
    %207 = vector.shape_cast %205 : vector<4x8x8xf32> to vector<1x4x8x8xf32>
    %208 = tpu.concatenate %206, %207 in 0 : vector<1x4x8x8xf32>, vector<1x4x8x8xf32> -> vector<2x4x8x8xf32>
    %c0_66 = arith.constant 0 : index
    %c0_67 = arith.constant 0 : index
    %c0_68 = arith.constant 0 : index
    %c0_69 = arith.constant 0 : index
    %209 = vector.load %arg6[%c0_66, %c0_67, %c0_68, %c0_69] : memref<2x4x8x8xf32, #tpu.memory_space<vmem>>, vector<2x4x8x8xf32>
    tpu.vector_store %arg6[%c0_66, %c0_67, %c0_68, %c0_69], %208 {strides = array<i32>} : memref<2x4x8x8xf32, #tpu.memory_space<vmem>>, vector<2x4x8x8xf32>,
    %210 = vector.broadcast %6 : vector<1x32xf32> to vector<16x32xf32>
    %211 = arith.addf %195, %210 : vector<16x32xf32>
    %212 = arith.addf %211, %0 : vector<16x32xf32>
    %cst_70 = arith.constant dense<0.000000e+00> : vector<16xf32>
    %213 = vector.multi_reduction <add>, %212, %cst_70 [1] : vector<16x32xf32> to vector<16xf32>
    %214 = vector.shape_cast %213 : vector<16xf32> to vector<16x1xf32>
    %cst_71 = arith.constant 3.200000e+01 : f32
    %215 = vector.broadcast %cst_71 : f32 to vector<16x1xf32>
    %216 = arith.divf %214, %215 : vector<16x1xf32>
    %217 = vector.broadcast %216 : vector<16x1xf32> to vector<16x32xf32>
    %218 = arith.subf %212, %217 : vector<16x32xf32>
    %219 = arith.mulf %218, %218 : vector<16x32xf32>
    %cst_72 = arith.constant dense<0.000000e+00> : vector<16xf32>
    %220 = vector.multi_reduction <add>, %219, %cst_72 [1] : vector<16x32xf32> to vector<16xf32>
    %221 = vector.shape_cast %220 : vector<16xf32> to vector<16x1xf32>
    %cst_73 = arith.constant 3.200000e+01 : f32
    %222 = vector.broadcast %cst_73 : f32 to vector<16x1xf32>
    %223 = arith.divf %221, %222 : vector<16x1xf32>
    %cst_74 = arith.constant 9.99999997E-7 : f32
    %224 = vector.broadcast %cst_74 : f32 to vector<16x1xf32>
    %225 = arith.addf %223, %224 : vector<16x1xf32>
    %226 = math.rsqrt %225 : vector<16x1xf32>
    %227 = vector.broadcast %216 : vector<16x1xf32> to vector<16x32xf32>
    %228 = arith.subf %212, %227 : vector<16x32xf32>
    %229 = vector.broadcast %226 : vector<16x1xf32> to vector<16x32xf32>
    %230 = arith.mulf %228, %229 : vector<16x32xf32>
    %231 = vector.broadcast %3 : vector<1x32xf32> to vector<16x32xf32>
    %232 = arith.mulf %230, %231 : vector<16x32xf32>
    %233 = vector.broadcast %4 : vector<1x32xf32> to vector<16x32xf32>
    %234 = arith.addf %232, %233 : vector<16x32xf32>
    %c0_75 = arith.constant 0 : index
    %c0_76 = arith.constant 0 : index
    %235 = vector.load %arg2[%c0_75, %c0_76] : memref<32x64xf32, #tpu.memory_space<vmem>>, vector<32x64xf32>
    %cst_77 = arith.constant dense<0.000000e+00> : vector<16x64xf32>
    %236 = tpu.matmul %234, %235, %cst_77 {dimension_numbers = #tpu.dot_dimension_numbers<[1], [0], [0], [1], [0, 0, 1, 1], [], []>} : vector<16x32xf32>, vector<32x64xf32>, vector<16x64xf32> -> vector<16x64xf32>
    %237 = vector.broadcast %7 : vector<1x64xf32> to vector<16x64xf32>
    %238 = arith.addf %236, %237 : vector<16x64xf32>
    %cst_78 = arith.constant 5.000000e-01 : f32
    %239 = vector.broadcast %cst_78 : f32 to vector<16x64xf32>
    %240 = arith.mulf %239, %238 : vector<16x64xf32>
    %cst_79 = arith.constant 4.471500e-02 : f32
    %241 = vector.broadcast %cst_79 : f32 to vector<16x64xf32>
    %242 = arith.mulf %241, %238 : vector<16x64xf32>
    %243 = arith.mulf %242, %238 : vector<16x64xf32>
    %244 = arith.mulf %243, %238 : vector<16x64xf32>
    %245 = arith.addf %238, %244 : vector<16x64xf32>
    %cst_80 = arith.constant 0.797884583 : f32
    %246 = vector.broadcast %cst_80 : f32 to vector<16x64xf32>
    %247 = arith.mulf %246, %245 : vector<16x64xf32>
    %248 = math.tanh %247 : vector<16x64xf32>
    %cst_81 = arith.constant 1.000000e+00 : f32
    %249 = vector.broadcast %cst_81 : f32 to vector<16x64xf32>
    %250 = arith.addf %249, %248 : vector<16x64xf32>
    %251 = arith.mulf %240, %250 : vector<16x64xf32>
    %c0_82 = arith.constant 0 : index
    %c0_83 = arith.constant 0 : index
    %252 = vector.load %arg3[%c0_82, %c0_83] : memref<64x32xf32, #tpu.memory_space<vmem>>, vector<64x32xf32>
    %cst_84 = arith.constant dense<0.000000e+00> : vector<16x32xf32>
    %253 = tpu.matmul %251, %252, %cst_84 {dimension_numbers = #tpu.dot_dimension_numbers<[1], [0], [0], [1], [0, 0, 1, 1], [], []>} : vector<16x64xf32>, vector<64x32xf32>, vector<16x32xf32> -> vector<16x32xf32>
    %254 = vector.broadcast %8 : vector<1x32xf32> to vector<16x32xf32>
    %255 = arith.addf %253, %254 : vector<16x32xf32>
    %256 = arith.addf %255, %212 : vector<16x32xf32>
    %c0_85 = arith.constant 0 : index
    %c0_86 = arith.constant 0 : index
    %257 = vector.load %arg5[%c0_85, %c0_86] : memref<16x32xf32, #tpu.memory_space<vmem>>, vector<16x32xf32>
    tpu.vector_store %arg5[%c0_85, %c0_86], %256 {strides = array<i32>} : memref<16x32xf32, #tpu.memory_space<vmem>>, vector<16x32xf32>,
    return
  }
}

</mosaic_0001>

<bundles_post_ra>
// kernel: block_forward.1
= control target key start
LH: loop header
LB: loop body
LE: loop exit
PB: predicated region body
PF: predicated region fallthrough
CT: control target
= control target key end

     0   :  { %12 = vsyncpa [#allocation3], 0  ;;  %vm34_vm0 = vcmask 261120   ;;  %s2876_s0 = inlined_call_operand.vmem [shape: f32[16,32], index: 0, kind: input, shape index: {}]   ;;  %s2877_s1 = inlined_call_operand.vmem [shape: f32[32,128], index: 1, kind: input, shape index: {}]   ;;  %s2878_s2 = inlined_call_operand.vmem [shape: f32[32,64], index: 2, kind: input, shape index: {}]   ;;  %s2879_s3 = inlined_call_operand.vmem [shape: f32[64,32], index: 3, kind: input, shape index: {}]   ;;  %s2880_s4 = inlined_call_operand.vmem [shape: f32[8,128], index: 4, kind: input, shape index: {}]   ;;  %s2881_s5 = inlined_call_operand.hbm [shape: f32[16,32], index: 5, kind: output, shape index: {0}]   ;;  %s2882_s6 = inlined_call_operand.hbm [shape: f32[2,4,8,8], index: 6, kind: output, shape index: {1}]  }
   0x1   :  { %v2585_v0 = vld [vmem:[%s2876_s0] sm:$0xff]  ;;  %v2590_v1 = vld [vmem:[%s2876_s0 + $0x8] sm:$0xff] }
   0x2   :  { %13 = vsyncpa [#allocation5], 0  ;;  %v35_v2 = vsel %vm34_vm0, %v2585_v0, 0.0  ;;  %v38_v3 = vsel %vm34_vm0, %v2590_v1, 0.0  ;;  %v2603_v14 = vld [vmem:[%s2877_s1] sm:$0xff]  ;;  %v2608_v15 = vld [vmem:[%s2877_s1 + $0x8] sm:$0xff] }
   0x3   :  { %36 = vadd.xlane.f32.xlu0 %v35_v2  ;;  %v2613_v16 = vld [vmem:[%s2877_s1 + $0x10] sm:$0xff]  ;;  %v2381_v17 = vpack.c.bf16 %v2608_v15, %v2603_v14  ;;  %v2620_v18 = vld [vmem:[%s2877_s1 + $0x18] sm:$0xff]  ;;  %v2128_v27 = vld [vmem:[%s2880_s4] ss:$0 sm:$0xff]  ;;  %v2529_v36 = vmov 0.0   ;;  %vm2530_vm1 = vmmov 0  }
   0x4   :  { %v2385_v19 = vpack.c.bf16 %v2620_v18, %v2613_v16  ;;  %v2129_v29 = vld [vmem:[%s2880_s4 + $0x1] ss:$0 sm:$0xff]  ;;  %2261 = vmatprep.subr.mxu0 %v2529_v36  ;;  %2263 = vmatprep.mubr.msk.f32.mxu0 %vm2530_vm1, %v2529_v36  ;;  %v2130_v37 = vld [vmem:[%s2880_s4 + $0x4] ss:$0 sm:$0xff]  ;;  %s2531_s13 = smov 96   ;;  %s2532_s14 = smov 88  }
   0x5   :  { %2382 = vmatprep.subr.bf16.mxu1 %v2381_v17  ;;  %s2533_s15 = smov 120   ;;  %vm167_vm2 = vcmask 64512   ;;  %s2534_s16 = smov 64   ;;  %vm2010_vm3 = vcmask 523264  }
   0x6   :  { %2384 = vmatpush3.bf16.msra.mxu1 %v2381_v17  ;;  %s2535_s17 = smov 56   ;;  %s2536_s18 = smov 32  }
   0x7   :  { %39 = vadd.xlane.f32.xlu0 %v38_v3  ;;  %2386 = vmatprep.subr.bf16.mxu1 %v2385_v19  ;;  %s2537_s19 = smov 80   ;;  %s2538_s20 = smov 112  }
   0x8   :  { %s2539_s21 = smov 48   ;;  %s2540_s22 = smov 72  }
   0x9   :  { %s2541_s23 = smov 104   ;;  %s2542_s24 = smov 40  }
   0xa   :  { %2388 = vmatpush3.bf16.msra.mxu1 %v2385_v19 }
   0xb   :  { %2251 = vmatprep.subr.mxu1 %v2529_v36 }
  0x90   :  { %v37_v4 = vpop.xlane.xlu0 %36 }
  0x91   :  { %v42_v5 = vmul.f32 0.03125, %v37_v4 }
  0x93   :  { %v44_v6 = vsub.f32 %v2585_v0, %v42_v5 }
  0x94   :  { %v40_v7 = vpop.xlane.xlu0 %39 }
  0x95   :  { %v43_v8 = vmul.f32 0.03125, %v40_v7  ;;  %v46_v9 = vmul.f32 %v44_v6, %v44_v6 }
  0x97   :  { %v45_v10 = vsub.f32 %v2590_v1, %v43_v8  ;;  %v48_v11 = vsel %vm34_vm0, %v46_v9, 0.0 }
  0x98   :  { %49 = vadd.xlane.f32.xlu1 %v48_v11 }
  0x99   :  { %v47_v12 = vmul.f32 %v45_v10, %v45_v10 }
  0x9b   :  { %v51_v13 = vsel %vm34_vm0, %v47_v12, 0.0 }
  0x9c   :  { %52 = vadd.xlane.f32.xlu1 %v51_v13 }
 0x125   :  { %v50_v20 = vpop.xlane.xlu1 %49 }
 0x126   :  { %v54_v21 = vmul.f32 0.03125, %v50_v20 }
 0x128   :  { %v56_v22 = vadd.f32 1e-06, %v54_v21 }
 0x129   :  { %v53_v23 = vpop.xlane.xlu1 %52 }
 0x12a   :  { %2437 = vrsqrt.f32 %v56_v22  ;;  %v55_v24 = vmul.f32 0.03125, %v53_v23 }
 0x12c   :  { %v57_v25 = vadd.f32 1e-06, %v55_v24 }
 0x12e   :  { %2439 = vrsqrt.f32 %v57_v25 }
 0x134   :  { %v2438_v26 = vpop.eup %2437 }
 0x135   :  { %v60_v28 = vmul.f32 %v2438_v26, %v44_v6 }
 0x137   :  { %v66_v30 = vmul.f32 %v2128_v27, %v60_v28 }
 0x138   :  { %v2440_v31 = vpop.eup %2439 }
 0x139   :  { %v61_v32 = vmul.f32 %v2440_v31, %v45_v10  ;;  %v72_v33 = vadd.f32 %v2129_v29, %v66_v30 }
 0x13b   :  { %v67_v34 = vmul.f32 %v2128_v27, %v61_v32  ;;  %2248 = vmatprep.mubr.msk.f32.mxu1 %vm34_vm0, %v72_v33 }
 0x13d   :  { %v73_v35 = vadd.f32 %v2129_v29, %v67_v34 }
 0x13f   :  { %2249 = vmatmul.mubr.msk.f32.vlgmr.msra.gmra.mrb[0].mxu1 %vm34_vm0, %v73_v35 }
 0x140   :  { %2253 = vmatprep.mubr.msk.f32.mxu1 %vm2530_vm1, %v2529_v36 }
 0x212   :  { %v2250_v38 = vpop.f32.mrb[0].mxu1 }
 0x213   :  { %v2641_v39 = vadd.f32 %v2250_v38, %v2130_v37  ;;  %v154_v40 = vpop.f32.mrb[1].mxu1 }
 0x214   :  { %v2643_v41 = vadd.f32 %v2130_v37, %v154_v40 }
 0x215   :  { %331 = vrot.lane.b32.xlu1 %v2641_v39, %s2531_s13 }
 0x216   :  { %165 = vrot.lane.b32.xlu0 %v2643_v41, %s2531_s13 }
 0x219   :  { %498 = vrot.lane.b32.xlu1 %v2643_v41, %s2532_s14 }
 0x21a   :  { %664 = vrot.lane.b32.xlu0 %v2641_v39, %s2532_s14 }
 0x21d   :  { %496 = vrot.lane.b32.xlu1 %v2643_v41, %s2533_s15 }
 0x221   :  { %662 = vrot.lane.b32.xlu1 %v2641_v39, %s2533_s15 }
 0x287   :  { %v332_v42 = vpop.permute.xlu1 %331 }
 0x288   :  { %2262 = vmatpush3.xpose.msk.msra.mxu0 %vm167_vm2, %v332_v42  ;;  %v166_v43 = vpop.permute.xlu0 %165 }
 0x289   :  { %2252 = vmatpush3.xpose.msk.msra.mxu1 %vm167_vm2, %v166_v43  ;;  %2271 = vmatprep.subr.mxu0 %v2529_v36 }
 0x28a   :  { %2256 = vmatprep.subr.mxu1 %v2529_v36 }
 0x28b   :  { %2264 = vmatmul.mubr.msk.f32.vlgmr.msra.gmra.mrb[0].mxu0 %vm167_vm2, %v2641_v39  ;;  %v499_v44 = vpop.permute.xlu1 %498 }
 0x28c   :  { %2254 = vmatmul.mubr.msk.f32.vlgmr.msra.gmra.mrb[2].mxu1 %vm167_vm2, %v2643_v41  ;;  %2272 = vmatpush3.xpose.msk.msra.mxu0 %vm167_vm2, %v499_v44  ;;  %v665_v46 = vpop.permute.xlu0 %664 }
 0x28d   :  { %2273 = vmatprep.mubr.msk.f32.mxu0 %vm2530_vm1, %v2529_v36  ;;  %2281 = vmatprep.subr.mxu0 %v2529_v36 }
 0x28e   :  { %2258 = vmatprep.mubr.msk.f32.mxu1 %vm2530_vm1, %v2529_v36 }
 0x28f   :  { %v497_v45 = vpop.permute.xlu1 %496 }
 0x290   :  { %2274 = vmatmul.mubr.msk.f32.vlgmr.msra.gmra.mrb[2].mxu0 %vm167_vm2, %v497_v45 }
 0x291   :  { %2282 = vmatpush3.xpose.msk.msra.mxu0 %vm167_vm2, %v665_v46  ;;  %2283 = vmatprep.mubr.msk.f32.mxu0 %vm2530_vm1, %v2529_v36 }
 0x293   :  { %v663_v47 = vpop.permute.xlu1 %662 }
 0x294   :  { %2284 = vmatmul.mubr.msk.f32.vlgmr.msra.gmra.mrb[4].mxu0 %vm167_vm2, %v663_v47 }
 0x35e   :  { %v403_v48 = vpop.f32.mrb[0].mxu0 }
 0x35f   :  { %v407_v49 = vmul.f32 0.35355338, %v403_v48  ;;  %v238_v50 = vpop.f32.mrb[2].mxu1  ;;  %v2265_v51 = vpop.f32.mrb[1].mxu0 }
 0x360   :  { %v242_v52 = vmul.f32 0.35355338, %v238_v50  ;;  %v2255_v53 = vpop.f32.mrb[3].mxu1 }
 0x361   :  { %v408_v54 = vsel %vm167_vm2, %v407_v49, -inf }
 0x362   :  { %409 = vmax.xlane.f32.xlu1 %v408_v54  ;;  %v243_v55 = vsel %vm167_vm2, %v242_v52, -inf }
 0x363   :  { %v570_v56 = vpop.f32.mrb[2].mxu0  ;;  %244 = vmax.xlane.f32.xlu0 %v243_v55 }
 0x364   :  { %v574_v57 = vmul.f32 0.35355338, %v570_v56  ;;  %v2275_v58 = vpop.f32.mrb[3].mxu0 }
 0x366   :  { %v575_v59 = vsel %vm167_vm2, %v574_v57, -inf }
 0x367   :  { %576 = vmax.xlane.f32.xlu0 %v575_v59  ;;  %v736_v60 = vpop.f32.mrb[4].mxu0 }
 0x368   :  { %v740_v61 = vmul.f32 0.35355338, %v736_v60  ;;  %v2285_v62 = vpop.f32.mrb[5].mxu0 }
 0x36a   :  { %v741_v63 = vsel %vm167_vm2, %v740_v61, -inf }
 0x36b   :  { %742 = vmax.xlane.f32.xlu0 %v741_v63 }
 0x3ef   :  { %v410_v2 = vpop.xlane.xlu1 %409 }
 0x3f0   :  { %v411_v3 = vsub.f32 %v407_v49, %v410_v2  ;;  %v245_v4 = vpop.xlane.xlu0 %244 }
 0x3f1   :  { %v246_v5 = vsub.f32 %v242_v52, %v245_v4 }
 0x3f2   :  { %v412_v6 = vmul.f32 1.442695, %v411_v3 }
 0x3f3   :  { %v247_v7 = vmul.f32 1.442695, %v246_v5 }
 0x3f4   :  { %2441 = vpow2.f32 %v412_v6  ;;  %v577_v8 = vpop.xlane.xlu0 %576 }
 0x3f5   :  { %2443 = vpow2.f32 %v247_v7  ;;  %v578_v9 = vsub.f32 %v574_v57, %v577_v8 }
 0x3f7   :  { %v579_v10 = vmul.f32 1.442695, %v578_v9 }
 0x3f8   :  { %v743_v21 = vpop.xlane.xlu0 %742 }
 0x3f9   :  { %2445 = vpow2.f32 %v579_v10  ;;  %v744_v22 = vsub.f32 %v740_v61, %v743_v21 }
 0x3fb   :  { %v745_v23 = vmul.f32 1.442695, %v744_v22 }
 0x3fd   :  { %2447 = vpow2.f32 %v745_v23 }
 0x3fe   :  { %v2442_v11 = vpop.eup %2441 }
 0x3ff   :  { %v2444_v12 = vpop.eup %2443  ;;  %v414_v13 = vsel %vm167_vm2, %v2442_v11, 0.0 }
 0x400   :  { %415 = vadd.xlane.f32.xlu1 %v414_v13  ;;  %v249_v17 = vsel %vm167_vm2, %v2444_v12, 0.0 }
 0x401   :  { %250 = vadd.xlane.f32.xlu0 %v249_v17 }
 0x403   :  { %v2446_v19 = vpop.eup %2445 }
 0x404   :  { %v581_v20 = vsel %vm167_vm2, %v2446_v19, 0.0 }
 0x405   :  { %582 = vadd.xlane.f32.xlu0 %v581_v20 }
 0x407   :  { %v2448_v24 = vpop.eup %2447 }
 0x408   :  { %v747_v25 = vsel %vm167_vm2, %v2448_v24, 0.0 }
 0x411   :  { %419 = vrot.lane.b32.xlu1 %v2641_v39, %s2534_s16 }
 0x415   :  { %586 = vrot.lane.b32.xlu1 %v2643_v41, %s2535_s17 }
 0x41b   :  { %254 = vrot.lane.b32.xlu0 %v2643_v41, %s2534_s16 }
 0x41f   :  { %829 = vrot.lane.b32.xlu0 %v2608_v15, %s2536_s18 }
 0x423   :  { %1001 = vrot.lane.b32.xlu0 %v2643_v41, %s2537_s19 }
 0x427   :  { %1167 = vrot.lane.b32.xlu0 %v2641_v39, %s2537_s19 }
 0x439   :  { %748 = vadd.xlane.f32.xlu1 %v747_v25 }
 0x44a   :  { %752 = vrot.lane.b32.xlu1 %v2641_v39, %s2535_s17 }
 0x44e   :  { %914 = vrot.lane.b32.xlu1 %v2603_v14, %s2536_s18 }
 0x452   :  { %999 = vrot.lane.b32.xlu1 %v2643_v41, %s2538_s20 }
 0x456   :  { %1165 = vrot.lane.b32.xlu1 %v2641_v39, %s2538_s20 }
 0x48d   :  { %v416_v15 = vpop.xlane.xlu1 %415 }
 0x48e   :  { %2449 = vrcp.f32 %v416_v15  ;;  %v251_v26 = vpop.xlane.xlu0 %250 }
 0x48f   :  { %2451 = vrcp.f32 %v251_v26 }
 0x491   :  { %v420_v14 = vpop.permute.xlu1 %419 }
 0x492   :  { %v583_v27 = vpop.xlane.xlu0 %582 }
 0x493   :  { %2453 = vrcp.f32 %v583_v27 }
 0x495   :  { %v587_v37 = vpop.permute.xlu1 %586 }
 0x496   :  { %v255_v28 = vpop.permute.xlu0 %254 }
 0x497   :  { %2257 = vmatpush3.msra.mxu1 %v255_v28 }
 0x498   :  { %v2450_v29 = vpop.eup %2449  ;;  %2266 = vmatprep.subr.mxu1 %v2529_v36 }
 0x499   :  { %v2452_v30 = vpop.eup %2451  ;;  %v418_v31 = vmul.f32 %v2450_v29, %v2442_v11 }
 0x49a   :  { %v253_v32 = vmul.f32 %v2452_v30, %v2444_v12  ;;  %v830_v33 = vpop.permute.xlu0 %829 }
 0x49b   :  { %1841 = vst.msk [vmem:[#allocation4 + $0x20] sm:$0xff] %vm167_vm2, %v418_v31  ;;  %2291 = vmatprep.subr.mxu0 %v830_v33 }
 0x49c   :  { %1837 = vst.msk [vmem:[#allocation4] sm:$0xff] %vm167_vm2, %v253_v32  ;;  %2259 = vmatmul.mubr.msk.f32.vlgmr.msra.gmra.mrb[4].mxu1 %vm167_vm2, %v253_v32  ;;  %2292 = vmatpush3.msra.mxu0 %v830_v33 }
 0x49d   :  { %v2454_v34 = vpop.eup %2453  ;;  %2267 = vmatpush3.msra.mxu1 %v420_v14  ;;  %2268 = vmatprep.mubr.msk.f32.mxu1 %vm2530_vm1, %v2529_v36 }
 0x49e   :  { %v585_v35 = vmul.f32 %v2454_v34, %v2446_v19  ;;  %2276 = vmatprep.subr.mxu1 %v2529_v36  ;;  %v1002_v45 = vpop.permute.xlu0 %1001 }
 0x4a0   :  { %1838 = vst.msk [vmem:[#allocation4 + $0x8] sm:$0xff] %vm167_vm2, %v585_v35  ;;  %2269 = vmatmul.mubr.msk.f32.vlgmr.msra.gmra.mrb[6].mxu1 %vm167_vm2, %v418_v31 }
 0x4a1   :  { %2277 = vmatpush3.msra.mxu1 %v587_v37  ;;  %2278 = vmatprep.mubr.msk.f32.mxu1 %vm2530_vm1, %v2529_v36 }
 0x4a2   :  { %2286 = vmatprep.subr.mxu1 %v2529_v36  ;;  %v1168_v59 = vpop.permute.xlu0 %1167 }
 0x4a4   :  { %2279 = vmatmul.mubr.msk.f32.vlgmr.msra.gmra.mrb[8].mxu1 %vm167_vm2, %v585_v35 }
 0x4a5   :  { %2288 = vmatprep.mubr.msk.f32.mxu1 %vm2530_vm1, %v2529_v36 }
 0x4c6   :  { %v749_v38 = vpop.xlane.xlu1 %748 }
 0x4c7   :  { %2455 = vrcp.f32 %v749_v38 }
 0x4ca   :  { %v753_v40 = vpop.permute.xlu1 %752 }
 0x4cb   :  { %2287 = vmatpush3.msra.mxu1 %v753_v40 }
 0x4cc   :  { %2301 = vmatprep.subr.mxu1 %v2529_v36 }
 0x4ce   :  { %v915_v42 = vpop.permute.xlu1 %914 }
 0x4cf   :  { %2296 = vmatprep.subr.mxu0 %v915_v42 }
 0x4d1   :  { %v2456_v43 = vpop.eup %2455 }
 0x4d2   :  { %v751_v44 = vmul.f32 %v2456_v43, %v2448_v24  ;;  %v1000_v46 = vpop.permute.xlu1 %999 }
 0x4d4   :  { %1842 = vst.msk [vmem:[#allocation4 + $0x28] sm:$0xff] %vm167_vm2, %v751_v44  ;;  %2289 = vmatmul.mubr.msk.f32.vlgmr.msra.gmra.mrb[10].mxu1 %vm167_vm2, %v751_v44 }
 0x4d5   :  { %2302 = vmatpush3.xpose.msk.msra.mxu1 %vm167_vm2, %v1002_v45  ;;  %2303 = vmatprep.mubr.msk.f32.mxu1 %vm2530_vm1, %v2529_v36 }
 0x4d6   :  { %2306 = vmatprep.subr.mxu1 %v2529_v36  ;;  %v1166_v60 = vpop.permute.xlu1 %1165 }
 0x4d8   :  { %2304 = vmatmul.mubr.msk.f32.vlgmr.msra.gmra.mrb[12].mxu1 %vm167_vm2, %v1000_v46 }
 0x4d9   :  { %2308 = vmatprep.mubr.msk.f32.mxu1 %vm2530_vm1, %v2529_v36 }
 0x56f   :  { %v326_v47 = vpop.f32.mrb[4].mxu1 }
 0x570   :  { %v2260_v48 = vpop.f32.mrb[5].mxu1 }
 0x573   :  { %v491_v49 = vpop.f32.mrb[6].mxu1 }
 0x574   :  { %v2270_v50 = vpop.f32.mrb[7].mxu1 }
 0x577   :  { %v658_v51 = vpop.f32.mrb[8].mxu1 }
 0x578   :  { %v2280_v52 = vpop.f32.mrb[9].mxu1  ;;  %2293 = vmatprep.mubr.msk.f32.mxu0 %vm167_vm2, %v658_v51 }
 0x5a7   :  { %v824_v53 = vpop.f32.mrb[10].mxu1 }
 0x5a8   :  { %v2290_v54 = vpop.f32.mrb[11].mxu1  ;;  %2294 = vmatmul.mubr.msk.f32.vlgmr.msra.gmra.mrb[6].mxu0 %vm167_vm2, %v824_v53 }
 0x5a9   :  { %2297 = vmatpush3.msra.mxu0 %v915_v42  ;;  %2298 = vmatprep.mubr.msk.f32.mxu0 %vm167_vm2, %v326_v47 }
 0x5aa   :  { %2311 = vmatprep.subr.mxu0 %v2529_v36 }
 0x5ab   :  { %v1073_v55 = vpop.f32.mrb[12].mxu1 }
 0x5ac   :  { %v1077_v56 = vmul.f32 0.35355338, %v1073_v55  ;;  %v2305_v57 = vpop.f32.mrb[13].mxu1 }
 0x5ae   :  { %v1078_v58 = vsel %vm167_vm2, %v1077_v56, -inf }
 0x5af   :  { %1079 = vmax.xlane.f32.xlu0 %v1078_v58 }
 0x5b0   :  { %2299 = vmatmul.mubr.msk.f32.vlgmr.msra.gmra.mrb[6].mxu0 %vm167_vm2, %v491_v49 }
 0x5b1   :  { %2312 = vmatpush3.xpose.msk.msra.mxu0 %vm167_vm2, %v1168_v59  ;;  %2313 = vmatprep.mubr.msk.f32.mxu0 %vm2530_vm1, %v2529_v36 }
 0x5b4   :  { %2314 = vmatmul.mubr.msk.f32.vlgmr.msra.gmra.mrb[8].mxu0 %vm167_vm2, %v1166_v60 }
 0x63c   :  { %v1080_v61 = vpop.xlane.xlu0 %1079 }
 0x63d   :  { %v1081_v62 = vsub.f32 %v1077_v56, %v1080_v61 }
 0x63f   :  { %v1082_v63 = vmul.f32 1.442695, %v1081_v62  ;;  %v2165_v62 = vld [vmem:[%s2880_s4 + $0x5] ss:$0 sm:$0xff] }
 0x641   :  { %2457 = vpow2.f32 %v1082_v63 }
 0x64b   :  { %v2458_v2 = vpop.eup %2457 }
 0x64c   :  { %v1084_v3 = vsel %vm167_vm2, %v2458_v2, 0.0 }
 0x64d   :  { %1085 = vadd.xlane.f32.xlu0 %v1084_v3 }
 0x687   :  { %v1239_v4 = vpop.f32.mrb[8].mxu0 }
 0x688   :  { %v1243_v5 = vmul.f32 0.35355338, %v1239_v4  ;;  %v2315_v6 = vpop.f32.mrb[9].mxu0 }
 0x68a   :  { %v1244_v7 = vsel %vm167_vm2, %v1243_v5, -inf }
 0x68b   :  { %1245 = vmax.xlane.f32.xlu1 %v1244_v7 }
 0x69c   :  { %1255 = vrot.lane.b32.xlu1 %v2641_v39, %s2539_s21 }
 0x6a0   :  { %1420 = vrot.lane.b32.xlu1 %v2643_v41, %s2540_s22 }
 0x6a4   :  { %1418 = vrot.lane.b32.xlu1 %v2643_v41, %s2541_s23 }
 0x6a8   :  { %1584 = vrot.lane.b32.xlu1 %v2641_v39, %s2541_s23 }
 0x6da   :  { %v1086_v8 = vpop.xlane.xlu0 %1085 }
 0x6db   :  { %2459 = vrcp.f32 %v1086_v8 }
 0x6e5   :  { %v2460_v9 = vpop.eup %2459 }
 0x6e6   :  { %v1088_v10 = vmul.f32 %v2460_v9, %v2458_v2 }
 0x6e8   :  { %1839 = vst.msk [vmem:[#allocation4 + $0x10] sm:$0xff] %vm167_vm2, %v1088_v10 }
 0x718   :  { %v1246_v11 = vpop.xlane.xlu1 %1245 }
 0x719   :  { %v1247_v12 = vsub.f32 %v1243_v5, %v1246_v11 }
 0x71b   :  { %v1248_v13 = vmul.f32 1.442695, %v1247_v12 }
 0x71c   :  { %v1256_v21 = vpop.permute.xlu1 %1255 }
 0x71d   :  { %2461 = vpow2.f32 %v1248_v13 }
 0x720   :  { %v1421_v23 = vpop.permute.xlu1 %1420 }
 0x724   :  { %v1419_v15 = vpop.permute.xlu1 %1418 }
 0x727   :  { %v2462_v17 = vpop.eup %2461 }
 0x728   :  { %v1250_v19 = vsel %vm167_vm2, %v2462_v17, 0.0  ;;  %v1585_v27 = vpop.permute.xlu1 %1584 }
 0x729   :  { %1251 = vadd.xlane.f32.xlu0 %v1250_v19 }
 0x73f   :  { %1089 = vrot.lane.b32.xlu0 %v2643_v41, %s2539_s21 }
 0x743   :  { %1586 = vrot.lane.b32.xlu0 %v2641_v39, %s2540_s22 }
 0x7b6   :  { %v1252_v20 = vpop.xlane.xlu0 %1251 }
 0x7b7   :  { %2463 = vrcp.f32 %v1252_v20  ;;  %v1891_v20 = vld [vmem:[%s2878_s2] sm:$0xff] }
 0x7ba   :  { %v1090_v22 = vpop.permute.xlu0 %1089 }
 0x7bb   :  { %2307 = vmatpush3.msra.mxu1 %v1090_v22 }
 0x7bc   :  { %2309 = vmatmul.mubr.msk.f32.vlgmr.msra.gmra.mrb[14].mxu1 %vm167_vm2, %v1088_v10  ;;  %2316 = vmatprep.subr.mxu1 %v2529_v36 }
 0x7bd   :  { %2317 = vmatpush3.msra.mxu1 %v1256_v21  ;;  %2318 = vmatprep.mubr.msk.f32.mxu1 %vm2530_vm1, %v2529_v36  ;;  %v1892_v21 = vld [vmem:[%s2878_s2 + $0x8] sm:$0xff] }
 0x7be   :  { %2326 = vmatprep.subr.mxu1 %v2529_v36  ;;  %v1587_v26 = vpop.permute.xlu0 %1586  ;;  %v2389_v22 = vpack.c.bf16 %v1892_v21, %v1891_v20 }
 0x7c1   :  { %v2464_v24 = vpop.eup %2463 }
 0x7c2   :  { %v1254_v25 = vmul.f32 %v2464_v24, %v2462_v17  ;;  %v1894_v24 = vld [vmem:[%s2878_s2 + $0x18] sm:$0xff] }
 0x7c4   :  { %1843 = vst.msk [vmem:[#allocation4 + $0x30] sm:$0xff] %vm167_vm2, %v1254_v25  ;;  %2319 = vmatmul.mubr.msk.f32.vlgmr.msra.gmra.mrb[16].mxu1 %vm167_vm2, %v1254_v25 }
 0x7c5   :  { %2327 = vmatpush3.xpose.msk.msra.mxu1 %vm167_vm2, %v1421_v23  ;;  %2328 = vmatprep.mubr.msk.f32.mxu1 %vm2530_vm1, %v2529_v36  ;;  %v1893_v23 = vld [vmem:[%s2878_s2 + $0x10] sm:$0xff] }
 0x7c6   :  { %2336 = vmatprep.subr.mxu1 %v2529_v36  ;;  %v2393_v25 = vpack.c.bf16 %v1894_v24, %v1893_v23 }
 0x7c8   :  { %2329 = vmatmul.mubr.msk.f32.vlgmr.msra.gmra.mrb[18].mxu1 %vm167_vm2, %v1419_v15 }
 0x7c9   :  { %2337 = vmatpush3.xpose.msk.msra.mxu1 %vm167_vm2, %v1587_v26  ;;  %2338 = vmatprep.mubr.msk.f32.mxu1 %vm2530_vm1, %v2529_v36 }
 0x7ca   :  { %2390 = vmatprep.subr.bf16.mxu1 %v2389_v22 }
 0x7cc   :  { %2339 = vmatmul.mubr.msk.f32.vlgmr.msra.gmra.mrb[20].mxu1 %vm167_vm2, %v1585_v27 }
 0x7cd   :  { %2392 = vmatpush3.bf16.msra.mxu1 %v2389_v22 }
 0x7ce   :  { %2394 = vmatprep.subr.bf16.mxu1 %v2393_v25 }
 0x7d1   :  { %2396 = vmatpush3.bf16.msra.mxu1 %v2393_v25 }
 0x88f   :  { %v1161_v28 = vpop.f32.mrb[14].mxu1 }
 0x890   :  { %v2310_v29 = vpop.f32.mrb[15].mxu1  ;;  %2323 = vmatprep.mubr.msk.f32.mxu0 %vm167_vm2, %v1161_v28 }
 0x897   :  { %v1327_v30 = vpop.f32.mrb[16].mxu1 }
 0x898   :  { %v2320_v31 = vpop.f32.mrb[17].mxu1 }
 0x89b   :  { %v1492_v32 = vpop.f32.mrb[18].mxu1 }
 0x89c   :  { %v1496_v14 = vmul.f32 0.35355338, %v1492_v32  ;;  %v2330_v33 = vpop.f32.mrb[19].mxu1  ;;  %v2166_v32 = vld [vmem:[%s2880_s4 + $0x2] ss:$0 sm:$0xff] }
 0x89d   :  { %v2167_v33 = vld [vmem:[%s2880_s4 + $0x3] ss:$0 sm:$0xff] }
 0x89e   :  { %v1497_v34 = vsel %vm167_vm2, %v1496_v14, -inf }
 0x89f   :  { %1498 = vmax.xlane.f32.xlu0 %v1497_v34  ;;  %v1658_v35 = vpop.f32.mrb[20].mxu1 }
 0x8a0   :  { %v1662_v37 = vmul.f32 0.35355338, %v1658_v35  ;;  %v2340_v38 = vpop.f32.mrb[21].mxu1 }
 0x8a2   :  { %v1663_v40 = vsel %vm167_vm2, %v1662_v37, -inf }
 0x8a3   :  { %1664 = vmax.xlane.f32.xlu1 %v1663_v40 }
 0x8b4   :  { %1508 = vrot.lane.b32.xlu1 %v2643_v41, %s2542_s24 }
 0x8b8   :  { %1674 = vrot.lane.b32.xlu1 %v2641_v39, %s2542_s24 }
 0x8bc   :  { %1751 = vrot.lane.b32.xlu1 %v2620_v18, %s2536_s18 }
 0x92c   :  { %v1499_v42 = vpop.xlane.xlu0 %1498 }
 0x92d   :  { %v1500_v43 = vsub.f32 %v1496_v14, %v1499_v42 }
 0x92f   :  { %v1501_v44 = vmul.f32 1.442695, %v1500_v43  ;;  %v1998_v43 = vld [vmem:[%s2879_s3] sm:$0xff] }
 0x930   :  { %v1665_v45 = vpop.xlane.xlu1 %1664 }
 0x931   :  { %2465 = vpow2.f32 %v1501_v44  ;;  %v1666_v46 = vsub.f32 %v1662_v37, %v1665_v45  ;;  %v1999_v44 = vld [vmem:[%s2879_s3 + $0x8] sm:$0xff] }
 0x932   :  { %v2397_v45 = vpack.c.bf16 %v1999_v44, %v1998_v43 }
 0x933   :  { %v1667_v47 = vmul.f32 1.442695, %v1666_v46  ;;  %v2000_v46 = vld [vmem:[%s2879_s3 + $0x10] sm:$0xff] }
 0x934   :  { %v1509_v52 = vpop.permute.xlu1 %1508 }
 0x935   :  { %2467 = vpow2.f32 %v1667_v47  ;;  %v2001_v47 = vld [vmem:[%s2879_s3 + $0x18] sm:$0xff] }
 0x938   :  { %v1675_v55 = vpop.permute.xlu1 %1674 }
 0x93b   :  { %v2466_v48 = vpop.eup %2465 }
 0x93c   :  { %v1503_v49 = vsel %vm167_vm2, %v2466_v48, 0.0  ;;  %v1752_v57 = vpop.permute.xlu1 %1751 }
 0x93d   :  { %1504 = vadd.xlane.f32.xlu0 %v1503_v49  ;;  %v2002_v49 = vld [vmem:[%s2879_s3 + $0x20] sm:$0xff] }
 0x93f   :  { %v2468_v50 = vpop.eup %2467 }
 0x940   :  { %v1669_v41 = vsel %vm167_vm2, %v2468_v50, 0.0 }
 0x941   :  { %1670 = vadd.xlane.f32.xlu0 %v1669_v41 }
 0x957   :  { %1332 = vrot.lane.b32.xlu0 %v2613_v16, %s2536_s18 }
 0x9ca   :  { %v1505_v18 = vpop.xlane.xlu0 %1504 }
 0x9cb   :  { %2469 = vrcp.f32 %v1505_v18  ;;  %v2004_v18 = vld [vmem:[%s2879_s3 + $0x30] sm:$0xff] }
 0x9ce   :  { %v1671_v39 = vpop.xlane.xlu0 %1670 }
 0x9cf   :  { %2471 = vrcp.f32 %v1671_v39  ;;  %v2005_v39 = vld [vmem:[%s2879_s3 + $0x38] sm:$0xff] }
 0x9d2   :  { %v1333_v51 = vpop.permute.xlu0 %1332 }
 0x9d3   :  { %2321 = vmatprep.subr.mxu0 %v1333_v51 }
 0x9d4   :  { %2322 = vmatpush3.msra.mxu0 %v1333_v51  ;;  %v2409_v51 = vpack.c.bf16 %v2005_v39, %v2004_v18 }
 0x9d5   :  { %v2470_v53 = vpop.eup %2469  ;;  %2324 = vmatmul.mubr.msk.f32.vlgmr.msra.gmra.mrb[6].mxu0 %vm167_vm2, %v1327_v30  ;;  %2331 = vmatprep.subr.mxu0 %v2529_v36 }
 0x9d6   :  { %v1507_v54 = vmul.f32 %v2470_v53, %v2466_v48  ;;  %2332 = vmatpush3.msra.mxu0 %v1509_v52  ;;  %2333 = vmatprep.mubr.msk.f32.mxu0 %vm2530_vm1, %v2529_v36  ;;  %v2401_v48 = vpack.c.bf16 %v2001_v47, %v2000_v46  ;;  %v2168_v52 = vld [vmem:[%s2880_s4 + $0x6] ss:$0 sm:$0xff] }
 0x9d7   :  { %2341 = vmatprep.subr.mxu0 %v2529_v36 }
 0x9d8   :  { %1840 = vst.msk [vmem:[#allocation4 + $0x18] sm:$0xff] %vm167_vm2, %v1507_v54 }
 0x9d9   :  { %v2472_v16 = vpop.eup %2471  ;;  %2334 = vmatmul.mubr.msk.f32.vlgmr.msra.gmra.mrb[10].mxu0 %vm167_vm2, %v1507_v54 }
 0x9da   :  { %v1673_v56 = vmul.f32 %v2472_v16, %v2468_v50  ;;  %2342 = vmatpush3.msra.mxu0 %v1675_v55  ;;  %2343 = vmatprep.mubr.msk.f32.mxu0 %vm2530_vm1, %v2529_v36  ;;  %v2003_v50 = vld [vmem:[%s2879_s3 + $0x28] sm:$0xff]  ;;  %s2543_s3 = smov [#allocation4]  }
 0x9db   :  { %2346 = vmatprep.subr.mxu0 %v1752_v57  ;;  %v2405_v41 = vpack.c.bf16 %v2003_v50, %v2002_v49  ;;  %s2113_s29 = sshll.u32 %s2543_s3, 4  ;;  %s2114_s29 = int_to_ptr.vmem [resolvable:$true] %s2113_s29 }
 0x9dc   :  { %1844 = vst.msk [vmem:[#allocation4 + $0x38] sm:$0xff] %vm167_vm2, %v1673_v56  ;;  %s2481_s30 = scalar_lea.vmem %s2114_s29, 1024  ;;  %p2486_p1 = scmp.lt.s32.totalorder %s2114_s29, %s2114_s29 }
 0x9dd   :  { %2344 = vmatmul.mubr.msk.f32.vlgmr.msra.gmra.mrb[12].mxu0 %vm167_vm2, %v1673_v56  ;;  %p2482_p0 = scmp.ne.s32.totalorder %s2114_s29, %s2481_s30  ;;  %p2487_p2 = scmp.lt.s32.totalorder %s2481_s30, %s2481_s30 }
 0x9de   :  { %2347 = vmatpush3.msra.mxu0 %v1752_v57 }
 0x9df   :  { %2398 = vmatprep.subr.bf16.mxu0 %v2397_v45  ;;  %p2488_p3 = por %p2487_p2, %p2486_p1 }
 0x9e1   :  { %p2489_p4 = pnand %p2488_p3, %p2482_p0 }
 0xaac   :  { %v1580_v58 = vpop.f32.mrb[10].mxu0 }
 0xaad   :  { %v2335_v59 = vpop.f32.mrb[11].mxu0  ;;  %2348 = vmatprep.mubr.msk.f32.mxu0 %vm167_vm2, %v1580_v58 }
 0xab0   :  { %v1746_v60 = vpop.f32.mrb[12].mxu0 }
 0xab1   :  { %v2345_v61 = vpop.f32.mrb[13].mxu0  ;;  %2349 = vmatmul.mubr.msk.f32.vlgmr.msra.gmra.mrb[6].mxu0 %vm167_vm2, %v1746_v60 }
 0xab2   :  { %2400 = vmatpush3.bf16.msra.mxu0 %v2397_v45 }
 0xab3   :  { %2402 = vmatprep.subr.bf16.mxu0 %v2401_v48 }
 0xab6   :  { %2404 = vmatpush3.bf16.msra.mxu0 %v2401_v48 }
 0xab7   :  { %2406 = vmatprep.subr.bf16.mxu0 %v2405_v41 }
 0xaba   :  { %2408 = vmatpush3.bf16.msra.mxu0 %v2405_v41 }
 0xabb   :  { %2410 = vmatprep.subr.bf16.mxu0 %v2409_v51 }
 0xabe   :  { %2412 = vmatpush3.bf16.msra.mxu0 %v2409_v51 }
 0xb84   :  { %v2350_v36 = vpop.f32.mrb[6].mxu0 }
 0xb85   :  { %v1850_v63 = vadd.f32 %v2350_v36, %v2165_v62  ;;  %v1826_v2 = vpop.f32.mrb[7].mxu0 }
 0xb86   :  { %v1849_v3 = vadd.f32 %v2165_v62, %v1826_v2 }
 0xb87   :  { %v2779_v4 = vadd.f32 %v1850_v63, %v2590_v1 }
 0xb88   :  { %v2782_v5 = vadd.f32 %v1849_v3, %v2585_v0 }
 0xb89   :  { %v1856_v6 = vsel %vm34_vm0, %v2779_v4, 0.0 }
 0xb8a   :  { %1857 = vadd.xlane.f32.xlu1 %v1856_v6  ;;  %v1853_v7 = vsel %vm34_vm0, %v2782_v5, 0.0 }
 0xb8b   :  { %1854 = vadd.xlane.f32.xlu0 %v1853_v7 }
 0xc17   :  { %v1858_v8 = vpop.xlane.xlu1 %1857 }
 0xc18   :  { %v1860_v9 = vmul.f32 0.03125, %v1858_v8  ;;  %v1855_v10 = vpop.xlane.xlu0 %1854 }
 0xc19   :  { %v1859_v11 = vmul.f32 0.03125, %v1855_v10 }
 0xc1a   :  { %v1862_v12 = vsub.f32 %v2779_v4, %v1860_v9 }
 0xc1b   :  { %v1861_v1 = vsub.f32 %v2782_v5, %v1859_v11 }
 0xc1c   :  { %v1864_v17 = vmul.f32 %v1862_v12, %v1862_v12 }
 0xc1d   :  { %v1863_v13 = vmul.f32 %v1861_v1, %v1861_v1 }
 0xc1e   :  { %v1868_v19 = vsel %vm34_vm0, %v1864_v17, 0.0 }
 0xc1f   :  { %v1865_v0 = vsel %vm34_vm0, %v1863_v13, 0.0 }
 0xc20   :  { %1866 = vadd.xlane.f32.xlu0 %v1865_v0 }
 0xc24   :  { %1869 = vadd.xlane.f32.xlu0 %v1868_v19 }
 0xcad   :  { %v1867_v15 = vpop.xlane.xlu0 %1866 }
 0xcae   :  { %v1871_v26 = vmul.f32 0.03125, %v1867_v15 }
 0xcb0   :  { %v1873_v27 = vadd.f32 1e-06, %v1871_v26 }
 0xcb1   :  { %v1870_v28 = vpop.xlane.xlu0 %1869 }
 0xcb2   :  { %2473 = vrsqrt.f32 %v1873_v27  ;;  %v1872_v29 = vmul.f32 0.03125, %v1870_v28 }
 0xcb4   :  { %v1874_v30 = vadd.f32 1e-06, %v1872_v29 }
 0xcb6   :  { %2475 = vrsqrt.f32 %v1874_v30 }
 0xcbc   :  { %v2474_v31 = vpop.eup %2473 }
 0xcbd   :  { %v1877_v14 = vmul.f32 %v2474_v31, %v1861_v1 }
 0xcbf   :  { %v1883_v34 = vmul.f32 %v2166_v32, %v1877_v14 }
 0xcc0   :  { %v2476_v35 = vpop.eup %2475 }
 0xcc1   :  { %v1878_v37 = vmul.f32 %v2476_v35, %v1862_v12  ;;  %v1889_v38 = vadd.f32 %v2167_v33, %v1883_v34 }
 0xcc3   :  { %v1884_v40 = vmul.f32 %v2166_v32, %v1878_v37  ;;  %2359 = vmatprep.mubr.msk.f32.mxu1 %vm34_vm0, %v1889_v38 }
 0xcc5   :  { %v1890_v42 = vadd.f32 %v2167_v33, %v1884_v40 }
 0xcc7   :  { %2360 = vmatmul.mubr.msk.f32.vlgmr.msra.gmra.mrb[22].mxu1 %vm34_vm0, %v1890_v42 }
 0xd9a   :  { %v2361_v53 = vpop.f32.mrb[22].mxu1 }
 0xd9b   :  { %v1977_v54 = vadd.f32 %v2361_v53, %v2168_v52  ;;  %v1971_v16 = vpop.f32.mrb[23].mxu1 }
 0xd9c   :  { %v1972_v55 = vadd.f32 %v2168_v52, %v1971_v16 }
 0xd9d   :  { %v1983_v56 = vmul.f32 0.044715, %v1977_v54  ;;  %v1981_v10 = vmul.f32 0.5, %v1977_v54 }
 0xd9e   :  { %v1982_v57 = vmul.f32 0.044715, %v1972_v55  ;;  %v1980_v8 = vmul.f32 0.5, %v1972_v55 }
 0xd9f   :  { %v1985_v58 = vmul.f32 %v1983_v56, %v1977_v54 }
 0xda0   :  { %v1984_v59 = vmul.f32 %v1982_v57, %v1972_v55 }
 0xda1   :  { %v1987_v60 = vmul.f32 %v1985_v58, %v1977_v54 }
 0xda2   :  { %v1986_v61 = vmul.f32 %v1984_v59, %v1972_v55 }
 0xda3   :  { %v1989_v62 = vadd.f32 %v1987_v60, %v1977_v54 }
 0xda4   :  { %v1988_v36 = vadd.f32 %v1986_v61, %v1972_v55 }
 0xda5   :  { %v1991_v63 = vmul.f32 0.7978846, %v1989_v62 }
 0xda6   :  { %v1990_v2 = vmul.f32 0.7978846, %v1988_v36 }
 0xda7   :  { %2477 = vtanh.f32 %v1991_v63 }
 0xda8   :  { %2479 = vtanh.f32 %v1990_v2 }
 0xdb1   :  { %v2478_v3 = vpop.eup %2477 }
 0xdb2   :  { %v2480_v6 = vpop.eup %2479  ;;  %v1995_v7 = vadd.f32 1.0, %v2478_v3 }
 0xdb3   :  { %v1994_v9 = vadd.f32 1.0, %v2480_v6 }
 0xdb4   :  { %v1997_v12 = vmul.f32 %v1995_v7, %v1981_v10 }
 0xdb5   :  { %v1996_v11 = vmul.f32 %v1994_v9, %v1980_v8 }
 0xdb7   :  { %2378 = vmatprep.mubr.msk.f32.mxu0 %vm2010_vm3, %v1996_v11 }
 0xdb8   :  { %2379 = vmatmul.mubr.msk.f32.vlgmr.msra.gmra.mrb[14].mxu0 %vm2010_vm3, %v1997_v12 }
 0xdb9   :  { %2492 = shalt.err (!%p2489_p4)
}
 0xdba   :  { %s2493_s9 = scalar_lea.hbm %s2882_s6, 1024 }
 0xdbb   :  { %p2494_p5 = scmp.ne.s32.totalorder %s2882_s6, %s2493_s9  ;;  %p2497_p6 = scmp.lt.u32.totalorder %s2493_s9, %s2882_s6 }
 0xdbd   :  { %p2499_p7 = pnand %p2497_p6, %p2494_p5 }
 0xdbf   :  { %2502 = shalt.err (!%p2499_p7)
}
 0xdc0   :  { %s2544_s2 = smov 128   ;;  %s2545_s13 = smov 8   ;;  %v2171_v1 = vld [vmem:[%s2880_s4 + $0x7] ss:$0 sm:$0xff] }
 0xdc1   :  { %2119 = dma.vmem_to_hbm [thread:$0]  %s2114_s29, 1024, %s2882_s6, [#allocation5], %s2544_s2, %s2544_s2, %s2545_s13  }
 0xdc2   :  { %s2546_s18 = smov [#allocation2]  }
 0xdc3   :  { %s2101_s19 = sshll.u32 %s2546_s18, 4  ;;  %s2102_s19 = int_to_ptr.vmem [resolvable:$true] %s2101_s19 }
 0xdc4   :  { %s2503_s6 = scalar_lea.vmem %s2102_s19, 256  ;;  %p2508_p9 = scmp.lt.s32.totalorder %s2102_s19, %s2102_s19 }
 0xdc5   :  { %p2504_p8 = scmp.ne.s32.totalorder %s2102_s19, %s2503_s6  ;;  %p2509_p10 = scmp.lt.s32.totalorder %s2503_s6, %s2503_s6 }
 0xdc7   :  { %p2510_p11 = por %p2509_p10, %p2508_p9 }
 0xdc9   :  { %p2511_p12 = pnand %p2510_p11, %p2504_p8 }
 0xe8b   :  { %v2380_v13 = vpop.f32.mrb[14].mxu0 }
 0xe8c   :  { %v2089_v0 = vadd.f32 %v2380_v13, %v2171_v1  ;;  %v2083_v17 = vpop.f32.mrb[15].mxu0 }
 0xe8d   :  { %v2084_v19 = vadd.f32 %v2171_v1, %v2083_v17 }
 0xe8e   :  { %v2093_v20 = vadd.f32 %v2089_v0, %v2779_v4 }
 0xe8f   :  { %v2092_v21 = vadd.f32 %v2084_v19, %v2782_v5 }
 0xe90   :  { %2095 = vst.msk [vmem:[#allocation2 + $0x8] sm:$0xff] %vm34_vm0, %v2093_v20 }
 0xe91   :  { %2094 = vst.msk [vmem:[#allocation2] sm:$0xff] %vm34_vm0, %v2092_v21 }
 0xe92   :  { %2514 = shalt.err (!%p2511_p12)
}
 0xe93   :  { %s2515_s21 = scalar_lea.hbm %s2881_s5, 256 }
 0xe94   :  { %p2516_p13 = scmp.ne.s32.totalorder %s2881_s5, %s2515_s21  ;;  %p2519_p0 = scmp.lt.u32.totalorder %s2515_s21, %s2881_s5 }
 0xe96   :  { %p2521_p1 = pnand %p2519_p0, %p2516_p13 }
 0xe98   :  { %2524 = shalt.err (!%p2521_p1)
}
 0xe99   :  { %2107 = dma.vmem_to_hbm [thread:$0]  %s2102_s19, 256, %s2881_s5, [#allocation3], %s2544_s2, %s2544_s2, %s2545_s13  }
 0xe9a   :  { %2525 = dma.done.wait [#allocation3], 256  }
 0xe9b   :  { %2526 = vsyncadd [#allocation3], 4294967040 }
 0xe9c   :  { %2527 = dma.done.wait [#allocation5], 1024  }
 0xe9d   :  { %2528 = vsyncadd [#allocation5], 4294966272 }
 0xe9e   :  { %2126 = vsyncpa [#allocation3], 1 }
 0xe9f   :  { %2127 = vsyncpa [#allocation5], 1 }

</bundles_post_ra>
